<compile_context>
chip_gen: v7x
topology: tpu7x:2x2x1
jax: 0.10.0
libtpu: 0.0.40
codegen_flags: <defaults>
</compile_context>

<pallas_src>
import functools
import math

import jax
import jax.numpy as jnp
from jax.experimental import pallas as pl
from jax.experimental.pallas import tpu as pltpu


def _round_up(x: int, m: int) -> int:
    return (x + m - 1) // m * m


def _linear_kernel_bias(x_ref, w_ref, b_ref, o_ref, acc_ref):
    # x_ref: (tm, tk), w_ref: (tk, tn), b_ref: (1, tn), o_ref: (tm, tn)
    k = pl.program_id(2)

    @pl.when(k == 0)
    def _init():
        acc_ref[...] = jnp.zeros_like(acc_ref)

    acc_ref[...] += jnp.dot(
        x_ref[...], w_ref[...], preferred_element_type=jnp.float32
    )

    @pl.when(k == pl.num_programs(2) - 1)
    def _finalize():
        o_ref[...] = (acc_ref[...] + b_ref[...].astype(jnp.float32)).astype(
            o_ref.dtype
        )


def _linear_kernel_nobias(x_ref, w_ref, o_ref, acc_ref):
    k = pl.program_id(2)

    @pl.when(k == 0)
    def _init():
        acc_ref[...] = jnp.zeros_like(acc_ref)

    acc_ref[...] += jnp.dot(
        x_ref[...], w_ref[...], preferred_element_type=jnp.float32
    )

    @pl.when(k == pl.num_programs(2) - 1)
    def _finalize():
        o_ref[...] = acc_ref[...].astype(o_ref.dtype)


@functools.partial(jax.jit, static_argnames=("tm_max", "tn_max", "tk_max"))
def custom_linear(x, weight, bias=None, *, tm_max=256, tn_max=256, tk_max=512):
    """Pallas implementation of CustomLinear.forward.

    x:      [..., in_features]
    weight: [out_features, in_features]   (same layout as torch nn.Linear)
    bias:   [out_features] or None
    returns [..., out_features]
    """
    out_features, in_features = weight.shape
    orig_shape = x.shape
    assert orig_shape[-1] == in_features

    # Glue: flatten leading dims into a single M axis.
    x2d = x.reshape(-1, in_features)
    M, K, N = x2d.shape[0], in_features, out_features

    # Tile sizes: sublane-aligned M, lane-dense (multiple-of-128) N and K.
    tm = min(tm_max, _round_up(M, 8))
    tn = min(tn_max, _round_up(N, 128))
    tk = min(tk_max, _round_up(K, 128))

    M_pad = _round_up(M, tm)
    K_pad = _round_up(K, tk)
    N_pad = _round_up(N, tn)

    x_p = x2d
    if (M_pad, K_pad) != (M, K):
        x_p = jnp.pad(x2d, ((0, M_pad - M), (0, K_pad - K)))

    # One-time layout plumbing in HBM: [N, K] -> [K, N] so the kernel does a
    # straight (tm,tk) x (tk,tn) MXU contraction with no in-kernel transpose.
    w_t = weight.T
    if (K_pad, N_pad) != (K, N):
        w_t = jnp.pad(w_t, ((0, K_pad - K), (0, N_pad - N)))

    grid = (M_pad // tm, N_pad // tn, K_pad // tk)
    out_shape = jax.ShapeDtypeStruct((M_pad, N_pad), x.dtype)

    itemsize = jnp.dtype(x.dtype).itemsize
    bytes_accessed = (
        M * K * itemsize + K * N * itemsize + M * N * itemsize
        + (N * itemsize if bias is not None else 0)
    )
    cost = pl.CostEstimate(
        flops=2 * M * N * K, transcendentals=0, bytes_accessed=bytes_accessed
    )

    compiler_params = pltpu.CompilerParams(
        dimension_semantics=("parallel", "parallel", "arbitrary"),
        vmem_limit_bytes=32 * 1024 * 1024,  # safe on v5e/v6e/v7x with these tiles
    )

    x_spec = pl.BlockSpec((tm, tk), lambda i, j, k: (i, k))
    w_spec = pl.BlockSpec((tk, tn), lambda i, j, k: (k, j))
    o_spec = pl.BlockSpec((tm, tn), lambda i, j, k: (i, j))
    scratch = [pltpu.VMEM((tm, tn), jnp.float32)]

    if bias is not None:
        b2d = bias.reshape(1, N)
        if N_pad != N:
            b2d = jnp.pad(b2d, ((0, 0), (0, N_pad - N)))
        b_spec = pl.BlockSpec((1, tn), lambda i, j, k: (0, j))
        out = pl.pallas_call(
            _linear_kernel_bias,
            out_shape=out_shape,
            grid=grid,
            in_specs=[x_spec, w_spec, b_spec],
            out_specs=o_spec,
            scratch_shapes=scratch,
            compiler_params=compiler_params,
            cost_estimate=cost,
        )(x_p, w_t, b2d)
    else:
        out = pl.pallas_call(
            _linear_kernel_nobias,
            out_shape=out_shape,
            grid=grid,
            in_specs=[x_spec, w_spec],
            out_specs=o_spec,
            scratch_shapes=scratch,
            compiler_params=compiler_params,
            cost_estimate=cost,
        )(x_p, w_t)

    out = out[:M, :N]
    return out.reshape(*orig_shape[:-1], out_features)


def init_params(key, in_features, out_features, bias=True, dtype=jnp.float32):
    """Deterministic parameter init mirroring nn.Linear-style kaiming_uniform."""
    kw, kb = jax.random.split(key)
    # kaiming_uniform_(a=sqrt(5)) -> bound = sqrt(6 / ((1 + 5) * fan_in)) = 1/sqrt(fan_in)
    fan_in = in_features
    w_bound = 1.0 / math.sqrt(fan_in)
    weight = jax.random.uniform(
        kw, (out_features, in_features), dtype=dtype, minval=-w_bound, maxval=w_bound
    )
    if bias:
        b_bound = 1.0 / math.sqrt(fan_in) if fan_in > 0 else 0.0
        b = jax.random.uniform(
            kb, (out_features,), dtype=dtype, minval=-b_bound, maxval=b_bound
        )
    else:
        b = None
    return weight, b


if __name__ == "__main__":
    key = jax.random.PRNGKey(0)
    k_x, k_p, k_x2, k_p2 = jax.random.split(key, 4)

    # --- Primary test: module-sized small shapes (with bias) ---
    batch, seq, in_features, out_features = 2, 8, 32, 64
    x = jax.random.normal(k_x, (batch, seq, in_features), dtype=jnp.float32)
    weight, bias = init_params(k_p, in_features, out_features, bias=True)

    y = custom_linear(x, weight, bias)
    y = jax.block_until_ready(y)

    y_ref = jnp.matmul(x, weight.T) + bias
    assert y.shape == (batch, seq, out_features)
    assert jnp.allclose(y, y_ref, atol=1e-5, rtol=1e-5)

    # --- Secondary test: exercises N padding, multi-tile N, multi-step K
    #     accumulation (init/finalize path), and the no-bias kernel variant ---
    in2, out2 = 256, 192
    x2 = jax.random.normal(k_x2, (batch, seq, in2), dtype=jnp.float32)
    w2, _ = init_params(k_p2, in2, out2, bias=False)

    y2 = custom_linear(x2, w2, None, tn_max=128, tk_max=128)
    y2 = jax.block_until_ready(y2)
    y2_ref = jnp.matmul(x2, w2.T)
    assert y2.shape == (batch, seq, out2)
    assert jnp.allclose(y2, y2_ref, atol=1e-4, rtol=1e-4)

    print("KERNEL_OK")
</pallas_src>

<mosaic_0001>
module attributes {stable_mosaic.version = 11 : i64} {
  func.func @_linear_kernel_bias(%arg0: i32, %arg1: i32, %arg2: i32, %arg3: memref<16x128xf32, #tpu.memory_space<vmem>>, %arg4: memref<128x128xf32, #tpu.memory_space<vmem>>, %arg5: memref<1x128xf32, #tpu.memory_space<vmem>>, %arg6: memref<16x128xf32, #tpu.memory_space<vmem>>, %arg7: memref<16x128xf32, #tpu.memory_space<vmem>>) attributes {dimension_semantics = [#tpu.dimension_semantics<parallel>, #tpu.dimension_semantics<parallel>, #tpu.dimension_semantics<arbitrary>], iteration_bounds = array<i64: 1, 1, 1>, scalar_prefetch = 0 : i64, scratch_operands = 1 : i64, tpu.core_type = #tpu.core_type<tc>, window_params = [{transform_indices = @transform_0, window_bounds = array<i64: 16, 128>}, {transform_indices = @transform_1, window_bounds = array<i64: 128, 128>}, {transform_indices = @transform_2, window_bounds = array<i64: 1, 128>}, {transform_indices = @transform_3, window_bounds = array<i64: 16, 128>}]} {
    %c0_i32 = arith.constant 0 : i32
    %0 = arith.cmpi eq, %arg2, %c0_i32 : i32
    %1 = arith.extui %0 : i1 to i32
    %c0_i32_0 = arith.constant 0 : i32
    %2 = arith.cmpi ne, %1, %c0_i32_0 : i32
    scf.if %2 {
      %cst_10 = arith.constant 0.000000e+00 : f32
      %12 = vector.broadcast %cst_10 : f32 to vector<16x128xf32>
      %c0_11 = arith.constant 0 : index
      %c0_12 = arith.constant 0 : index
      %13 = vector.load %arg7[%c0_11, %c0_12] : memref<16x128xf32, #tpu.memory_space<vmem>>, vector<16x128xf32>
      tpu.vector_store %arg7[%c0_11, %c0_12], %12 {strides = array<i32>} : memref<16x128xf32, #tpu.memory_space<vmem>>, vector<16x128xf32>,
    } else {
    }
    %c0 = arith.constant 0 : index
    %c0_1 = arith.constant 0 : index
    %3 = vector.load %arg7[%c0, %c0_1] : memref<16x128xf32, #tpu.memory_space<vmem>>, vector<16x128xf32>
    %c0_2 = arith.constant 0 : index
    %c0_3 = arith.constant 0 : index
    %4 = vector.load %arg3[%c0_2, %c0_3] : memref<16x128xf32, #tpu.memory_space<vmem>>, vector<16x128xf32>
    %c0_4 = arith.constant 0 : index
    %c0_5 = arith.constant 0 : index
    %5 = vector.load %arg4[%c0_4, %c0_5] : memref<128x128xf32, #tpu.memory_space<vmem>>, vector<128x128xf32>
    %cst = arith.constant dense<0.000000e+00> : vector<16x128xf32>
    %6 = tpu.matmul %4, %5, %cst {dimension_numbers = #tpu.dot_dimension_numbers<[1], [0], [0], [1], [0, 0, 1, 1], [], []>} : vector<16x128xf32>, vector<128x128xf32>, vector<16x128xf32> -> vector<16x128xf32>
    %7 = arith.addf %3, %6 : vector<16x128xf32>
    %c0_6 = arith.constant 0 : index
    %c0_7 = arith.constant 0 : index
    %8 = vector.load %arg7[%c0_6, %c0_7] : memref<16x128xf32, #tpu.memory_space<vmem>>, vector<16x128xf32>
    tpu.vector_store %arg7[%c0_6, %c0_7], %7 {strides = array<i32>} : memref<16x128xf32, #tpu.memory_space<vmem>>, vector<16x128xf32>,
    %c0_i32_8 = arith.constant 0 : i32
    %9 = arith.cmpi eq, %arg2, %c0_i32_8 : i32
    %10 = arith.extui %9 : i1 to i32
    %c0_i32_9 = arith.constant 0 : i32
    %11 = arith.cmpi ne, %10, %c0_i32_9 : i32
    scf.if %11 {
      %c0_10 = arith.constant 0 : index
      %c0_11 = arith.constant 0 : index
      %12 = vector.load %arg7[%c0_10, %c0_11] : memref<16x128xf32, #tpu.memory_space<vmem>>, vector<16x128xf32>
      %c0_12 = arith.constant 0 : index
      %c0_13 = arith.constant 0 : index
      %13 = vector.load %arg5[%c0_12, %c0_13] : memref<1x128xf32, #tpu.memory_space<vmem>>, vector<1x128xf32>
      %14 = vector.broadcast %13 : vector<1x128xf32> to vector<16x128xf32>
      %15 = arith.addf %12, %14 : vector<16x128xf32>
      %c0_14 = arith.constant 0 : index
      %c0_15 = arith.constant 0 : index
      %16 = vector.load %arg6[%c0_14, %c0_15] : memref<16x128xf32, #tpu.memory_space<vmem>>, vector<16x128xf32>
      tpu.vector_store %arg6[%c0_14, %c0_15], %15 {strides = array<i32>} : memref<16x128xf32, #tpu.memory_space<vmem>>, vector<16x128xf32>,
    } else {
    }
    return
  }
  func.func @transform_0(%arg0: i32, %arg1: i32, %arg2: i32) -> (i32, i32) {
    %c0_i32 = arith.constant 0 : i32
    return %arg0, %arg2 : i32, i32
  }
  func.func @transform_1(%arg0: i32, %arg1: i32, %arg2: i32) -> (i32, i32) {
    %c0_i32 = arith.constant 0 : i32
    return %arg2, %arg1 : i32, i32
  }
  func.func @transform_2(%arg0: i32, %arg1: i32, %arg2: i32) -> (i32, i32) {
    %c0_i32 = arith.constant 0 : i32
    %c0_i32_0 = arith.constant 0 : i32
    return %c0_i32, %arg1 : i32, i32
  }
  func.func @transform_3(%arg0: i32, %arg1: i32, %arg2: i32) -> (i32, i32) {
    %c0_i32 = arith.constant 0 : i32
    return %arg0, %arg1 : i32, i32
  }
}

</mosaic_0001>

<bundles_post_ra>
// kernel: custom_linear.1
= control target key start
LH: loop header
LB: loop body
LE: loop exit
PB: predicated region body
PF: predicated region fallthrough
CT: control target
= control target key end

     0   :  { %s308_s1 = inlined_call_operand.vmem [shape: f32[128,128], index: 1, kind: input, shape index: {}]   ;;  %s309_s0 = inlined_call_operand.vmem [shape: f32[16,128], index: 0, kind: input, shape index: {}]   ;;  %s310_s2 = inlined_call_operand.vmem [shape: f32[1,128], index: 2, kind: input, shape index: {}]   ;;  %s311_s3 = inlined_call_operand.vmem [shape: f32[16,128], index: 3, kind: output, shape index: {}]  }
   0x1   :  { %v24_v0 = vld [vmem:[%s308_s1] sm:$0xff]  ;;  %v25_v1 = vld [vmem:[%s308_s1 + $0x8] sm:$0xff]  ;;  %v26_v2 = vld [vmem:[%s308_s1 + $0x10] sm:$0xff] }
   0x2   :  { %v193_v3 = vpack.c.bf16 %v25_v1, %v24_v0  ;;  %v27_v4 = vld [vmem:[%s308_s1 + $0x18] sm:$0xff]  ;;  %v28_v6 = vld [vmem:[%s308_s1 + $0x20] sm:$0xff]  ;;  %v29_v7 = vld [vmem:[%s308_s1 + $0x28] sm:$0xff] }
   0x3   :  { %v197_v5 = vpack.c.bf16 %v27_v4, %v26_v2  ;;  %v201_v8 = vpack.c.bf16 %v29_v7, %v28_v6  ;;  %v22_v9 = vld [vmem:[%s309_s0] sm:$0xff]  ;;  %v30_v10 = vld [vmem:[%s308_s1 + $0x30] sm:$0xff]  ;;  %v31_v11 = vld [vmem:[%s308_s1 + $0x38] sm:$0xff] }
   0x4   :  { %194 = vmatprep.subr.bf16.mxu0 %v193_v3  ;;  %190 = vmatprep.mubr.f32.mxu0 %v22_v9  ;;  %v205_v12 = vpack.c.bf16 %v31_v11, %v30_v10  ;;  %v32_v13 = vld [vmem:[%s308_s1 + $0x40] sm:$0xff]  ;;  %v33_v14 = vld [vmem:[%s308_s1 + $0x48] sm:$0xff]  ;;  %v34_v16 = vld [vmem:[%s308_s1 + $0x50] sm:$0xff] }
   0x5   :  { %196 = vmatpush3.bf16.msra.mxu0 %v193_v3  ;;  %v209_v15 = vpack.c.bf16 %v33_v14, %v32_v13  ;;  %v35_v17 = vld [vmem:[%s308_s1 + $0x58] sm:$0xff]  ;;  %v36_v19 = vld [vmem:[%s308_s1 + $0x60] sm:$0xff]  ;;  %v37_v20 = vld [vmem:[%s308_s1 + $0x68] sm:$0xff] }
   0x6   :  { %198 = vmatprep.subr.bf16.mxu0 %v197_v5  ;;  %v213_v18 = vpack.c.bf16 %v35_v17, %v34_v16  ;;  %v217_v21 = vpack.c.bf16 %v37_v20, %v36_v19  ;;  %v38_v22 = vld [vmem:[%s308_s1 + $0x70] sm:$0xff]  ;;  %v39_v23 = vld [vmem:[%s308_s1 + $0x78] sm:$0xff]  ;;  %v23_v25 = vld [vmem:[%s309_s0 + $0x8] sm:$0xff] }
   0x7   :  { %v221_v24 = vpack.c.bf16 %v39_v23, %v38_v22  ;;  %v139_v26 = vld [vmem:[%s310_s2] ss:$0 sm:$0xff] }
   0x9   :  { %200 = vmatpush3.bf16.msra.mxu0 %v197_v5 }
   0xa   :  { %202 = vmatprep.subr.bf16.mxu0 %v201_v8 }
   0xd   :  { %204 = vmatpush3.bf16.msra.mxu0 %v201_v8 }
   0xe   :  { %206 = vmatprep.subr.bf16.mxu0 %v205_v12 }
  0x11   :  { %208 = vmatpush3.bf16.msra.mxu0 %v205_v12 }
  0x12   :  { %210 = vmatprep.subr.bf16.mxu0 %v209_v15 }
  0x15   :  { %212 = vmatpush3.bf16.msra.mxu0 %v209_v15 }
  0x16   :  { %214 = vmatprep.subr.bf16.mxu0 %v213_v18 }
  0x19   :  { %216 = vmatpush3.bf16.msra.mxu0 %v213_v18 }
  0x1a   :  { %218 = vmatprep.subr.bf16.mxu0 %v217_v21 }
  0x1d   :  { %220 = vmatpush3.bf16.msra.mxu0 %v217_v21 }
  0x1e   :  { %222 = vmatprep.subr.bf16.mxu0 %v221_v24 }
  0x21   :  { %224 = vmatpush3.bf16.msra.mxu0 %v221_v24 }
  0x24   :  { %191 = vmatmul.mubr.f32.vlgmr.msra.gmra.mrb[0].mxu0 %v23_v25 }
  0xf7   :  { %v192_v27 = vpop.f32.mrb[0].mxu0 }
  0xf8   :  { %v132_v28 = vadd.f32 %v192_v27, %v139_v26  ;;  %v106_v29 = vpop.f32.mrb[1].mxu0 }
  0xf9   :  { %v131_v30 = vadd.f32 %v139_v26, %v106_v29 }
  0xfa   :  { %134 = vst [vmem:[%s311_s3 + $0x8] sm:$0xff] %v132_v28 }
  0xfb   :  { %133 = vst [vmem:[%s311_s3] sm:$0xff] %v131_v30 }

</bundles_post_ra>
